<compile_context>
chip_gen: v7x
topology: tpu7x:2x2x1
jax: 0.10.0
libtpu: 0.0.40
codegen_flags: <defaults>
</compile_context>

<pallas_src>
import random

import jax
import jax.numpy as jnp
from jax.experimental import pallas as pl
from jax.experimental.pallas import tpu as pltpu

_VALID_TRACKS = {"all", "left", "right", "mix", "random-single", "random"}

_LANE = 128                              # lane width (last block dim)
_TARGET_BLOCK_BYTES = 2 * 1024 * 1024    # ~2 MiB input block per grid step


def _round_up(x: int, m: int) -> int:
    return ((x + m - 1) // m) * m


def _choose_row_tile(R: int, c_block: int, itemsize: int) -> int:
    """Rows-of-128 per block: ~2 MiB input blocks, multiple of 8 sublanes,
    capped so long tracks keep >= 4 grid steps (v7x megacore) and never
    exceeding the array's row extent."""
    target = max(8, (_TARGET_BLOCK_BYTES // (c_block * _LANE * itemsize)) // 8 * 8)
    if R < 8:
        return R                      # block second-minor == full array dim
    if R >= 32:
        target = min(target, max(8, (R // 4) // 8 * 8))
    return max(8, min(target, (R // 8) * 8))


# ---------------- Pallas kernels ----------------

def _copy_kernel(x_ref, o_ref):
    # 'left' / 'right': the BlockSpec already selected the channel; pure copy.
    o_ref[...] = x_ref[...]


def _make_mix_kernel(num_channels: int):
    inv_c = 1.0 / float(num_channels)

    def kernel(x_ref, o_ref):
        # x_ref block: (C, rows, 128).  Explicit per-channel adds (VPU) + one
        # scale; C is small and static, no cross-lane reduce needed.
        acc = x_ref[0].astype(jnp.float32)
        for c in range(1, num_channels):
            acc = acc + x_ref[c].astype(jnp.float32)
        o_ref[0] = (acc * inv_c).astype(o_ref.dtype)

    return kernel


# ---------------- wrapper mirroring the PyTorch module ----------------

class SoundTrackSelector:
    """Pallas/TPU reimplementation of the PyTorch SoundTrackSelector."""

    def __init__(self, mode: str):
        if mode not in _VALID_TRACKS:
            raise ValueError(
                f"mode must be one of {', '.join(_VALID_TRACKS)}, but got {mode}"
            )
        if mode == "random":
            mode = random.choice(["all", "left", "right", "mix"])
        if mode == "random-single":
            mode = random.choice(["left", "right", "mix"])
        self.select_mode = mode

    def __call__(self, audio_data: jax.Array) -> jax.Array:
        C, T = audio_data.shape
        mode = self.select_mode

        if mode == "all":
            # Pure identity: skip the kernel entirely (no HBM read/write).
            return audio_data

        if mode == "right" and C < 2:
            raise ValueError(f"'right' requires >= 2 channels, got {C}")

        itemsize = jnp.dtype(audio_data.dtype).itemsize

        # Pad T up to a lane multiple (<128 extra samples) so (C, T) can be
        # viewed sublane/lane-dense as (C, R, 128).  Pad copy only happens
        # for ragged tracks; aligned tracks are a free reshape.
        T_pad = _round_up(T, _LANE)
        x = audio_data
        if T_pad != T:
            x = jnp.pad(x, ((0, 0), (0, T_pad - T)))
        R = T_pad // _LANE
        x3 = x.reshape(C, R, _LANE)

        if mode in ("left", "right"):
            # Select the channel in the BlockSpec so the unused channel is
            # never DMA'd from HBM.
            ch = 0 if mode == "left" else 1
            c_block = 1
            kernel = _copy_kernel
            in_index_map = lambda r, _ch=ch: (_ch, r, 0)
        else:  # mix
            c_block = C
            kernel = _make_mix_kernel(C)
            in_index_map = lambda r: (0, r, 0)

        row_tile = _choose_row_tile(R, c_block, itemsize)
        grid = (pl.cdiv(R, row_tile),)   # partial last block handled by Pallas

        out3 = pl.pallas_call(
            kernel,
            out_shape=jax.ShapeDtypeStruct((1, R, _LANE), audio_data.dtype),
            grid=grid,
            in_specs=[pl.BlockSpec((c_block, row_tile, _LANE), in_index_map)],
            out_specs=pl.BlockSpec((1, row_tile, _LANE), lambda r: (0, r, 0)),
            compiler_params=pltpu.CompilerParams(
                dimension_semantics=("parallel",)
            ),
        )(x3)

        out = out3.reshape(1, T_pad)
        if T_pad != T:
            out = out[:, :T]
        return out


# ---------------- reference (pure JAX) for validation ----------------

def _reference(mode: str, x: jax.Array) -> jax.Array:
    if mode == "all":
        return x
    if mode == "left":
        return x[0:1, :]
    if mode == "right":
        return x[1:2, :]
    if mode == "mix":
        return jnp.mean(x, axis=0, keepdims=True)
    raise ValueError(mode)


if __name__ == "__main__":
    random.seed(0)  # makes 'random'/'random-single' modes deterministic too
    key = jax.random.PRNGKey(0)

    # deterministic "stereo waveforms": one lane-aligned, one ragged tail
    wav_even = jax.random.normal(key, (2, 2048), dtype=jnp.float32)
    wav_odd = jax.random.normal(jax.random.fold_in(key, 1), (2, 1000),
                                dtype=jnp.float32)

    ok = True
    for wav in (wav_even, wav_odd):
        for mode in ["all", "left", "right", "mix"]:
            selector = SoundTrackSelector(mode)
            out = jax.block_until_ready(selector(wav))
            ref = _reference(selector.select_mode, wav)
            if out.shape != ref.shape or not bool(
                jnp.allclose(out, ref, atol=1e-6, rtol=1e-6)
            ):
                ok = False
                print(f"MISMATCH mode={mode} shape={out.shape} ref={ref.shape}")

    if ok:
        print("KERNEL_OK")
</pallas_src>

<mosaic_0001>
module attributes {stable_mosaic.version = 11 : i64} {
  func.func @_copy_kernel(%arg0: i32, %arg1: memref<1x16x128xf32, #tpu.memory_space<vmem>>, %arg2: memref<1x16x128xf32, #tpu.memory_space<vmem>>) attributes {dimension_semantics = [#tpu.dimension_semantics<parallel>], iteration_bounds = array<i64: 1>, scalar_prefetch = 0 : i64, scratch_operands = 0 : i64, tpu.core_type = #tpu.core_type<tc>, window_params = [{transform_indices = @transform_0, window_bounds = array<i64: 1, 16, 128>}, {transform_indices = @transform_1, window_bounds = array<i64: 1, 16, 128>}]} {
    %c0 = arith.constant 0 : index
    %c0_0 = arith.constant 0 : index
    %c0_1 = arith.constant 0 : index
    %0 = vector.load %arg1[%c0, %c0_0, %c0_1] : memref<1x16x128xf32, #tpu.memory_space<vmem>>, vector<1x16x128xf32>
    %c0_2 = arith.constant 0 : index
    %c0_3 = arith.constant 0 : index
    %c0_4 = arith.constant 0 : index
    %1 = vector.load %arg2[%c0_2, %c0_3, %c0_4] : memref<1x16x128xf32, #tpu.memory_space<vmem>>, vector<1x16x128xf32>
    tpu.vector_store %arg2[%c0_2, %c0_3, %c0_4], %0 {strides = array<i32>} : memref<1x16x128xf32, #tpu.memory_space<vmem>>, vector<1x16x128xf32>,
    return
  }
  func.func @transform_0(%arg0: i32) -> (i32, i32, i32) {
    %c0_i32 = arith.constant 0 : i32
    %c0_i32_0 = arith.constant 0 : i32
    %c0_i32_1 = arith.constant 0 : i32
    return %c0_i32, %arg0, %c0_i32_0 : i32, i32, i32
  }
  func.func @transform_1(%arg0: i32) -> (i32, i32, i32) {
    %c0_i32 = arith.constant 0 : i32
    %c0_i32_0 = arith.constant 0 : i32
    %c0_i32_1 = arith.constant 0 : i32
    return %c0_i32, %arg0, %c0_i32_0 : i32, i32, i32
  }
}

</mosaic_0001>

<bundles_post_ra>
// kernel: tpu_custom_call.1
= control target key start
LH: loop header
LB: loop body
LE: loop exit
PB: predicated region body
PF: predicated region fallthrough
CT: control target
= control target key end

     0   :  { %6 = vsyncpa [#allocation3], 0  ;;  %s137_s0 = inlined_call_operand.hbm [shape: f32[2,16,128], index: 0, kind: input, shape index: {}]   ;;  %s138_s1 = inlined_call_operand.hbm [shape: f32[1,16,128], index: 1, kind: output, shape index: {}]  }
   0x1   :  { %7 = vsyncpa [#allocation4], 0  ;;  %s96_s6 = smov [#allocation2]   ;;  %s48_s10 = scalar_lea.hbm %s137_s0, 256 }
   0x2   :  { %s13_s7 = sshll.u32 %s96_s6, 4  ;;  %p49_p0 = scmp.ne.s32.totalorder %s137_s0, %s48_s10  ;;  %s14_s7 = int_to_ptr.vmem [resolvable:$true] %s13_s7 }
   0x3   :  { %s50_s15 = scalar_lea.hbm %s137_s0, 512  ;;  %p52_p2 = scmp.lt.u32.totalorder %s48_s10, %s137_s0 }
   0x4   :  { %p51_p1 = scmp.lt.u32.totalorder %s50_s15, %s48_s10 }
   0x6   :  { %p53_p3 = por %p52_p2, %p51_p1 }
   0x8   :  { %p54_p4 = pnand %p53_p3, %p49_p0 }
   0xa   :  { %57 = shalt.err (!%p54_p4)
}
   0xb   :  { %s58_s18 = scalar_lea.vmem %s14_s7, 256  ;;  %p63_p6 = scmp.lt.s32.totalorder %s14_s7, %s14_s7 }
   0xc   :  { %p59_p5 = scmp.ne.s32.totalorder %s14_s7, %s58_s18  ;;  %p64_p7 = scmp.lt.s32.totalorder %s58_s18, %s58_s18 }
   0xe   :  { %p65_p8 = por %p64_p7, %p63_p6 }
  0x10   :  { %p66_p9 = pnand %p65_p8, %p59_p5 }
  0x12   :  { %69 = shalt.err (!%p66_p9)
}
  0x13   :  { %s97_s19 = smov 128   ;;  %s98_s20 = smov 8  }
  0x14   :  { %19 = dma.hbm_to_vmem [thread:$0]  %s137_s0, 256, %s14_s7, [#allocation3], %s97_s19, %s97_s19, %s98_s20  }
  0x15   :  { %92 = dma.done.wait [#allocation3], 256  }
  0x16   :  { %93 = vsyncadd [#allocation3], 4294967040  ;;  %s99_s23 = smov [#allocation5]   ;;  %v23_v0 = vld [vmem:[#allocation2] sm:$0xff]  ;;  %v24_v1 = vld [vmem:[#allocation2 + $0x8] sm:$0xff] }
  0x17   :  { %s32_s24 = sshll.u32 %s99_s23, 4  ;;  %25 = vst [vmem:[#allocation5] sm:$0xff] %v23_v0  ;;  %26 = vst [vmem:[#allocation5 + $0x8] sm:$0xff] %v24_v1  ;;  %s33_s24 = int_to_ptr.vmem [resolvable:$true] %s32_s24 }
  0x18   :  { %s70_s25 = scalar_lea.vmem %s33_s24, 256  ;;  %p75_p11 = scmp.lt.s32.totalorder %s33_s24, %s33_s24 }
  0x19   :  { %p71_p10 = scmp.ne.s32.totalorder %s33_s24, %s70_s25  ;;  %p76_p12 = scmp.lt.s32.totalorder %s70_s25, %s70_s25 }
  0x1b   :  { %p77_p13 = por %p76_p12, %p75_p11 }
  0x1d   :  { %p78_p0 = pnand %p77_p13, %p71_p10 }
  0x1f   :  { %81 = shalt.err (!%p78_p0)
}
  0x20   :  { %s82_s0 = scalar_lea.hbm %s138_s1, 256 }
  0x21   :  { %p83_p1 = scmp.ne.s32.totalorder %s138_s1, %s82_s0  ;;  %p86_p2 = scmp.lt.u32.totalorder %s82_s0, %s138_s1 }
  0x23   :  { %p88_p3 = pnand %p86_p2, %p83_p1 }
  0x25   :  { %91 = shalt.err (!%p88_p3)
}
  0x26   :  { %38 = dma.vmem_to_hbm [thread:$0]  %s33_s24, 256, %s138_s1, [#allocation4], %s97_s19, %s97_s19, %s98_s20  }
  0x27   :  { %94 = dma.done.wait [#allocation4], 256  }
  0x28   :  { %95 = vsyncadd [#allocation4], 4294967040 }
  0x29   :  { %42 = vsyncpa [#allocation3], 1 }
  0x2a   :  { %43 = vsyncpa [#allocation4], 1 }

</bundles_post_ra>
